<compile_context>
chip_gen: v7x
topology: tpu7x:2x2x1
jax: 0.10.0
libtpu: 0.0.40
codegen_flags: <defaults>
</compile_context>

<pallas_src>
import functools

import jax
import jax.numpy as jnp
from jax.experimental import pallas as pl
from jax.experimental.pallas import tpu as pltpu


# ----------------------------------------------------------------------------
# Kernel 1: fused QKV projection, row-tiled over pixels.
#   x:[TM,C] @ w:[C, 2*qk+dim] + b  ->  q:[TM,qk], kv:[TM,qk+dim]
# ----------------------------------------------------------------------------
def _qkv_kernel(x_ref, w_ref, b_ref, q_ref, kv_ref, *, qk_dim):
    x = x_ref[...]
    y = jnp.dot(x, w_ref[...], preferred_element_type=jnp.float32) + b_ref[...]
    q_ref[...] = y[:, :qk_dim].astype(q_ref.dtype)
    kv_ref[...] = y[:, qk_dim:].astype(kv_ref.dtype)


# ----------------------------------------------------------------------------
# Kernel 2: routed window attention with data-dependent KV gather.
#   grid = (N, p2, topk); the KV block for step t is window r_idx[n, p, t]
#   (scalar-prefetched index table drives the BlockSpec index_map).
#   Online softmax over the topk axis; epilogue adds lepe and applies wo.
# ----------------------------------------------------------------------------
def _routed_attn_kernel(r_idx_ref, q_ref, kv_ref, lepe_ref, wo_ref, bo_ref,
                        out_ref, m_sc, l_sc, acc_sc,
                        *, num_heads, qk_dim, dim, scale):
    t = pl.program_id(2)

    @pl.when(t == 0)
    def _init():
        m_sc[...] = jnp.full(m_sc.shape, -jnp.inf, m_sc.dtype)
        l_sc[...] = jnp.zeros(l_sc.shape, l_sc.dtype)
        acc_sc[...] = jnp.zeros(acc_sc.shape, acc_sc.dtype)

    q = q_ref[...].astype(jnp.float32) * scale      # (w2, qk_dim)
    kv = kv_ref[...].astype(jnp.float32)            # (w2, qk_dim + dim)

    ch = qk_dim // num_heads
    cv = dim // num_heads
    for h in range(num_heads):                      # static unrolled head loop
        qh = q[:, h * ch:(h + 1) * ch]
        kh = kv[:, h * ch:(h + 1) * ch]
        vh = kv[:, qk_dim + h * cv:qk_dim + (h + 1) * cv]
        s = jnp.dot(qh, kh.T, preferred_element_type=jnp.float32)   # (w2, w2)

        m_prev = m_sc[:, h:h + 1]
        l_prev = l_sc[:, h:h + 1]
        acc_prev = acc_sc[:, h * cv:(h + 1) * cv]

        m_new = jnp.maximum(m_prev, jnp.max(s, axis=-1, keepdims=True))
        alpha = jnp.exp(m_prev - m_new)
        p = jnp.exp(s - m_new)
        l_sc[:, h:h + 1] = alpha * l_prev + jnp.sum(p, axis=-1, keepdims=True)
        acc_sc[:, h * cv:(h + 1) * cv] = alpha * acc_prev + jnp.dot(
            p, vh, preferred_element_type=jnp.float32)
        m_sc[:, h:h + 1] = m_new

    @pl.when(t == pl.num_programs(2) - 1)
    def _finalize():
        parts = [acc_sc[:, h * cv:(h + 1) * cv] / l_sc[:, h:h + 1]
                 for h in range(num_heads)]
        o = jnp.concatenate(parts, axis=-1)                      # (w2, dim)
        o = o + lepe_ref[...].astype(jnp.float32)                # fused lepe add
        o = jnp.dot(o, wo_ref[...],
                    preferred_element_type=jnp.float32) + bo_ref[...]  # fused wo
        out_ref[...] = o.astype(out_ref.dtype)


def _round_up(a, b):
    return (a + b - 1) // b * b


# ----------------------------------------------------------------------------
# Wrapper: full BiLevelRoutingAttention forward (NHWC in / NHWC out).
# ----------------------------------------------------------------------------
def bilevel_routing_attention_pallas(x, params, *, num_heads, n_win, topk,
                                     qk_dim=None, qk_scale=None):
    N, H, W, C = x.shape
    dim = C
    qk_dim = qk_dim or dim
    scale = qk_scale or qk_dim ** (-0.5)
    assert H % n_win == 0 and W % n_win == 0
    hh, ww = H // n_win, W // n_win
    p2, w2 = n_win * n_win, hh * ww
    c_kv = qk_dim + dim
    tot = qk_dim + c_kv

    # -- window partition: (N,H,W,C) -> (N, p2, w2, C) -----------------------
    xw = (x.reshape(N, n_win, hh, n_win, ww, C)
            .transpose(0, 1, 3, 2, 4, 5)
            .reshape(N, p2, w2, C))

    # -- QKV projection (Pallas, large row tiles; M padded, never ragged) ----
    M = N * p2 * w2
    TM = 1024
    if M < TM:
        TM = _round_up(M, 8)
    M_pad = _round_up(M, TM)
    x_flat = xw.reshape(M, C)
    if M_pad != M:
        x_flat = jnp.pad(x_flat, ((0, M_pad - M), (0, 0)))

    w_qkv_t = params["w_qkv"].T.astype(jnp.float32)            # (C, tot)
    b_qkv = params["b_qkv"].reshape(1, tot).astype(jnp.float32)

    q_flat, kv_flat = pl.pallas_call(
        functools.partial(_qkv_kernel, qk_dim=qk_dim),
        out_shape=(jax.ShapeDtypeStruct((M_pad, qk_dim), jnp.float32),
                   jax.ShapeDtypeStruct((M_pad, c_kv), jnp.float32)),
        grid_spec=pltpu.PrefetchScalarGridSpec(
            num_scalar_prefetch=0,
            grid=(M_pad // TM,),
            in_specs=[pl.BlockSpec((TM, C), lambda i: (i, 0)),
                      pl.BlockSpec((C, tot), lambda i: (0, 0)),
                      pl.BlockSpec((1, tot), lambda i: (0, 0))],
            out_specs=[pl.BlockSpec((TM, qk_dim), lambda i: (i, 0)),
                       pl.BlockSpec((TM, c_kv), lambda i: (i, 0))]),
        compiler_params=pltpu.CompilerParams(dimension_semantics=("parallel",)),
    )(x_flat, w_qkv_t, b_qkv)

    q_win = q_flat[:M].reshape(N, p2, w2, qk_dim)
    kv_win = kv_flat[:M].reshape(N, p2, w2, c_kv)

    # -- routing: window means + top-k (plain JAX; tiny (N,p2,p2) problem) ---
    # TODO(synk): top-k routing has no clean Pallas TPU primitive; lax.top_k used.
    q_mean = jnp.mean(q_win, axis=2)                         # (N, p2, qk_dim)
    k_mean = jnp.mean(kv_win[..., :qk_dim], axis=2)          # (N, p2, qk_dim)
    r_logit = jnp.einsum('npc,nqc->npq', q_mean * scale, k_mean)
    _, r_idx = jax.lax.top_k(r_logit, topk)                  # (N, p2, topk)
    r_idx = r_idx.astype(jnp.int32).reshape(-1)              # flat SMEM table

    # -- lepe: 3x3 depthwise conv on value channels (plain JAX) --------------
    # TODO(synk): depthwise 3x3 conv kept in XLA; negligible next to attention.
    v_img = (kv_win[..., qk_dim:]
             .reshape(N, n_win, n_win, hh, ww, dim)
             .transpose(0, 1, 3, 2, 4, 5)
             .reshape(N, H, W, dim))
    w_lepe = jnp.transpose(params["w_lepe"], (2, 3, 1, 0)).astype(jnp.float32)
    lepe_img = jax.lax.conv_general_dilated(
        v_img, w_lepe, (1, 1), [(1, 1), (1, 1)],
        dimension_numbers=("NHWC", "HWIO", "NHWC"),
        feature_group_count=dim) + params["b_lepe"].astype(jnp.float32)
    lepe_win = (lepe_img.reshape(N, n_win, hh, n_win, ww, dim)
                .transpose(0, 1, 3, 2, 4, 5)
                .reshape(N, p2, w2, dim))

    # -- routed attention + lepe add + wo projection (Pallas) ----------------
    w_o_t = params["w_o"].T.astype(jnp.float32)               # (dim, dim)
    b_o = params["b_o"].reshape(1, dim).astype(jnp.float32)

    kv_idx_map = lambda n, p, t, ri: (n, ri[(n * p2 + p) * topk + t], 0, 0)
    win_map = lambda n, p, t, ri: (n, p, 0, 0)
    const_map = lambda n, p, t, ri: (0, 0)

    out_win = pl.pallas_call(
        functools.partial(_routed_attn_kernel, num_heads=num_heads,
                          qk_dim=qk_dim, dim=dim, scale=scale),
        out_shape=jax.ShapeDtypeStruct((N, p2, w2, dim), x.dtype),
        grid_spec=pltpu.PrefetchScalarGridSpec(
            num_scalar_prefetch=1,
            grid=(N, p2, topk),
            in_specs=[pl.BlockSpec((None, None, w2, qk_dim), win_map),
                      pl.BlockSpec((None, None, w2, c_kv), kv_idx_map),
                      pl.BlockSpec((None, None, w2, dim), win_map),
                      pl.BlockSpec((dim, dim), const_map),
                      pl.BlockSpec((1, dim), const_map)],
            out_specs=pl.BlockSpec((None, None, w2, dim), win_map),
            scratch_shapes=[pltpu.VMEM((w2, num_heads), jnp.float32),
                            pltpu.VMEM((w2, num_heads), jnp.float32),
                            pltpu.VMEM((w2, dim), jnp.float32)]),
        compiler_params=pltpu.CompilerParams(
            dimension_semantics=("parallel", "parallel", "arbitrary")),
    )(r_idx, q_win, kv_win, lepe_win, w_o_t, b_o)

    # -- window de-partition: (N, p2, w2, dim) -> (N, H, W, dim) -------------
    out = (out_win.reshape(N, n_win, n_win, hh, ww, dim)
           .transpose(0, 1, 3, 2, 4, 5)
           .reshape(N, H, W, dim))
    return out


# ----------------------------------------------------------------------------
# Pure-JAX (XLA) reference mirroring the PyTorch forward exactly.
# ----------------------------------------------------------------------------
def bilevel_routing_attention_reference(x, params, *, num_heads, n_win, topk,
                                        qk_dim=None, qk_scale=None):
    N, H, W, C = x.shape
    dim = C
    qk_dim = qk_dim or dim
    scale = qk_scale or qk_dim ** (-0.5)
    hh, ww = H // n_win, W // n_win
    p2, w2 = n_win * n_win, hh * ww

    xw = (x.reshape(N, n_win, hh, n_win, ww, C)
            .transpose(0, 1, 3, 2, 4, 5)
            .reshape(N, p2, w2, C))
    qkv = xw @ params["w_qkv"].T + params["b_qkv"]
    q = qkv[..., :qk_dim]
    kv = qkv[..., qk_dim:]

    q_mean = q.mean(axis=2)
    k_mean = kv[..., :qk_dim].mean(axis=2)
    r_logit = jnp.einsum('npc,nqc->npq', q_mean * scale, k_mean)
    _, r_idx = jax.lax.top_k(r_logit, topk)

    kv_sel = jax.vmap(lambda kv_b, idx_b: kv_b[idx_b])(kv, r_idx)  # (N,p2,k,w2,c)
    k_sel = kv_sel[..., :qk_dim]
    v_sel = kv_sel[..., qk_dim:]

    ch = qk_dim // num_heads
    cv = dim // num_heads
    q_h = q.reshape(N, p2, w2, num_heads, ch)
    k_h = k_sel.reshape(N, p2, topk, w2, num_heads, ch)
    v_h = v_sel.reshape(N, p2, topk, w2, num_heads, cv)

    attn = jnp.einsum('npqmc,nptkmc->npmqtk', q_h * scale, k_h)
    attn = attn.reshape(N, p2, num_heads, w2, topk * w2)
    attn = jax.nn.softmax(attn, axis=-1)
    v_flat = v_h.transpose(0, 1, 4, 2, 3, 5).reshape(N, p2, num_heads, topk * w2, cv)
    out = jnp.einsum('npmqt,npmtc->npmqc', attn, v_flat)
    out = out.transpose(0, 1, 3, 2, 4).reshape(N, p2, w2, dim)

    v_img = (kv[..., qk_dim:]
             .reshape(N, n_win, n_win, hh, ww, dim)
             .transpose(0, 1, 3, 2, 4, 5)
             .reshape(N, H, W, dim))
    w_lepe = jnp.transpose(params["w_lepe"], (2, 3, 1, 0))
    lepe = jax.lax.conv_general_dilated(
        v_img, w_lepe, (1, 1), [(1, 1), (1, 1)],
        dimension_numbers=("NHWC", "HWIO", "NHWC"),
        feature_group_count=dim) + params["b_lepe"]

    out_img = (out.reshape(N, n_win, n_win, hh, ww, dim)
               .transpose(0, 1, 3, 2, 4, 5)
               .reshape(N, H, W, dim))
    out_img = out_img + lepe
    out_img = out_img @ params["w_o"].T + params["b_o"]
    return out_img


# ----------------------------------------------------------------------------
def make_params(key, dim, qk_dim):
    ks = jax.random.split(key, 6)
    nrm = lambda k, s, sc=0.1: sc * jax.random.normal(k, s, jnp.float32)
    tot = qk_dim + qk_dim + dim
    return {
        "w_qkv": nrm(ks[0], (tot, dim)),       # nn.Linear(dim, 2*qk+dim) weight
        "b_qkv": nrm(ks[1], (tot,)),
        "w_lepe": nrm(ks[2], (dim, 1, 3, 3)),  # depthwise Conv2d(dim,dim,3,groups=dim)
        "b_lepe": nrm(ks[3], (dim,)),
        "w_o": nrm(ks[4], (dim, dim)),         # nn.Linear(dim, dim)
        "b_o": nrm(ks[5], (dim,)),
    }


if __name__ == "__main__":
    N, H, W, C = 2, 8, 8, 32                 # dim=32, qk_dim=32
    num_heads, n_win, topk = 4, 2, 2         # p2=4 windows, w2=16 pixels/window

    key = jax.random.PRNGKey(0)
    kx, kp = jax.random.split(key)
    x = jax.random.normal(kx, (N, H, W, C), jnp.float32)
    params = make_params(kp, C, C)

    out = jax.block_until_ready(
        bilevel_routing_attention_pallas(x, params, num_heads=num_heads,
                                         n_win=n_win, topk=topk))
    expected = jax.block_until_ready(
        bilevel_routing_attention_reference(x, params, num_heads=num_heads,
                                            n_win=n_win, topk=topk))

    assert out.shape == (N, H, W, C), out.shape
    max_err = float(jnp.max(jnp.abs(out - expected)))
    assert max_err < 2e-2, f"max abs error {max_err}"
    print("KERNEL_OK")
</pallas_src>

<mosaic_0001>
module attributes {stable_mosaic.version = 11 : i64} {
  func.func @_qkv_kernel(%arg0: i32, %arg1: memref<128x32xf32, #tpu.memory_space<vmem>>, %arg2: memref<32x96xf32, #tpu.memory_space<vmem>>, %arg3: memref<1x96xf32, #tpu.memory_space<vmem>>, %arg4: memref<128x32xf32, #tpu.memory_space<vmem>>, %arg5: memref<128x64xf32, #tpu.memory_space<vmem>>) attributes {dimension_semantics = [#tpu.dimension_semantics<parallel>], iteration_bounds = array<i64: 1>, scalar_prefetch = 0 : i64, scratch_operands = 0 : i64, tpu.core_type = #tpu.core_type<tc>, window_params = [{transform_indices = @transform_0, window_bounds = array<i64: 128, 32>}, {pipeline_mode = #tpu.pipeline_mode<synchronous>, transform_indices = @transform_1, window_bounds = array<i64: 32, 96>}, {pipeline_mode = #tpu.pipeline_mode<synchronous>, transform_indices = @transform_2, window_bounds = array<i64: 1, 96>}, {transform_indices = @transform_3, window_bounds = array<i64: 128, 32>}, {transform_indices = @transform_4, window_bounds = array<i64: 128, 64>}]} {
    %c0 = arith.constant 0 : index
    %c0_0 = arith.constant 0 : index
    %0 = vector.load %arg1[%c0, %c0_0] : memref<128x32xf32, #tpu.memory_space<vmem>>, vector<128x32xf32>
    %c0_1 = arith.constant 0 : index
    %c0_2 = arith.constant 0 : index
    %1 = vector.load %arg2[%c0_1, %c0_2] : memref<32x96xf32, #tpu.memory_space<vmem>>, vector<32x96xf32>
    %cst = arith.constant dense<0.000000e+00> : vector<128x96xf32>
    %2 = tpu.matmul %0, %1, %cst {dimension_numbers = #tpu.dot_dimension_numbers<[1], [0], [0], [1], [0, 0, 1, 1], [], []>} : vector<128x32xf32>, vector<32x96xf32>, vector<128x96xf32> -> vector<128x96xf32>
    %c0_3 = arith.constant 0 : index
    %c0_4 = arith.constant 0 : index
    %3 = vector.load %arg3[%c0_3, %c0_4] : memref<1x96xf32, #tpu.memory_space<vmem>>, vector<1x96xf32>
    %4 = vector.broadcast %3 : vector<1x96xf32> to vector<128x96xf32>
    %5 = arith.addf %2, %4 : vector<128x96xf32>
    %6 = vector.extract_strided_slice %5 {offsets = [0, 0], sizes = [128, 32], strides = [1, 1]} : vector<128x96xf32> to vector<128x32xf32>
    %c0_5 = arith.constant 0 : index
    %c0_6 = arith.constant 0 : index
    %7 = vector.load %arg4[%c0_5, %c0_6] : memref<128x32xf32, #tpu.memory_space<vmem>>, vector<128x32xf32>
    tpu.vector_store %arg4[%c0_5, %c0_6], %6 {strides = array<i32>} : memref<128x32xf32, #tpu.memory_space<vmem>>, vector<128x32xf32>,
    %8 = vector.extract_strided_slice %5 {offsets = [0, 32], sizes = [128, 64], strides = [1, 1]} : vector<128x96xf32> to vector<128x64xf32>
    %c0_7 = arith.constant 0 : index
    %c0_8 = arith.constant 0 : index
    %9 = vector.load %arg5[%c0_7, %c0_8] : memref<128x64xf32, #tpu.memory_space<vmem>>, vector<128x64xf32>
    tpu.vector_store %arg5[%c0_7, %c0_8], %8 {strides = array<i32>} : memref<128x64xf32, #tpu.memory_space<vmem>>, vector<128x64xf32>,
    return
  }
  func.func @transform_0(%arg0: i32) -> (i32, i32) {
    %c0_i32 = arith.constant 0 : i32
    %c0_i32_0 = arith.constant 0 : i32
    return %arg0, %c0_i32 : i32, i32
  }
  func.func @transform_1(%arg0: i32) -> (i32, i32) {
    %c0_i32 = arith.constant 0 : i32
    %c0_i32_0 = arith.constant 0 : i32
    %c0_i32_1 = arith.constant 0 : i32
    return %c0_i32, %c0_i32_0 : i32, i32
  }
  func.func @transform_2(%arg0: i32) -> (i32, i32) {
    %c0_i32 = arith.constant 0 : i32
    %c0_i32_0 = arith.constant 0 : i32
    %c0_i32_1 = arith.constant 0 : i32
    return %c0_i32, %c0_i32_0 : i32, i32
  }
  func.func @transform_3(%arg0: i32) -> (i32, i32) {
    %c0_i32 = arith.constant 0 : i32
    %c0_i32_0 = arith.constant 0 : i32
    return %arg0, %c0_i32 : i32, i32
  }
  func.func @transform_4(%arg0: i32) -> (i32, i32) {
    %c0_i32 = arith.constant 0 : i32
    %c0_i32_0 = arith.constant 0 : i32
    return %arg0, %c0_i32 : i32, i32
  }
}

</mosaic_0001>

<bundles_post_ra>
// kernel: tpu_custom_call.1
= control target key start
LH: loop header
LB: loop body
LE: loop exit
PB: predicated region body
PF: predicated region fallthrough
CT: control target
= control target key end

     0   :  { %vm43_vm0 = vcmask 261120   ;;  %s424_s6 = smov 96   ;;  %vm317_vm1 = vcmask 523264   ;;  %s673_s1 = inlined_call_operand.vmem [shape: f32[32,96], index: 1, kind: input, shape index: {}]   ;;  %s674_s0 = inlined_call_operand.vmem [shape: f32[128,32], index: 0, kind: input, shape index: {}]   ;;  %s675_s2 = inlined_call_operand.vmem [shape: f32[1,96], index: 2, kind: input, shape index: {}]   ;;  %s676_s3 = inlined_call_operand.vmem [shape: f32[128,32], index: 3, kind: output, shape index: {0}]   ;;  %s677_s4 = inlined_call_operand.vmem [shape: f32[128,64], index: 4, kind: output, shape index: {1}]  }
   0x1   :  { %v32_v0 = vld [vmem:[%s673_s1] sm:$0xff]  ;;  %v33_v1 = vld [vmem:[%s673_s1 + $0x8] sm:$0xff]  ;;  %v34_v2 = vld [vmem:[%s673_s1 + $0x10] sm:$0xff] }
   0x2   :  { %v411_v3 = vpack.c.bf16 %v33_v1, %v32_v0  ;;  %v35_v4 = vld [vmem:[%s673_s1 + $0x18] sm:$0xff]  ;;  %v16_v5 = vld [vmem:[%s674_s0] sm:$0xff]  ;;  %v17_v8 = vld [vmem:[%s674_s0 + $0x8] sm:$0xff] }
   0x3   :  { %v24_v6 = vld [vmem:[%s674_s0 + $0x40] sm:$0xff]  ;;  %v415_v7 = vpack.c.bf16 %v35_v4, %v34_v2  ;;  %387 = vmatprep.mubr.msk.f32.mxu0 %vm43_vm0, %v16_v5  ;;  %v25_v9 = vld [vmem:[%s674_s0 + $0x48] sm:$0xff]  ;;  %v18_v10 = vld [vmem:[%s674_s0 + $0x10] sm:$0xff] }
   0x4   :  { %399 = vmatprep.mubr.msk.f32.mxu1 %vm43_vm0, %v24_v6  ;;  %412 = vmatprep.subr.bf16.mxu0 %v411_v3  ;;  %v26_v11 = vld [vmem:[%s674_s0 + $0x50] sm:$0xff]  ;;  %v19_v12 = vld [vmem:[%s674_s0 + $0x18] sm:$0xff]  ;;  %v20_v14 = vld [vmem:[%s674_s0 + $0x20] sm:$0xff] }
   0x5   :  { %419 = vmatprep.subr.bf16.mxu1 %v411_v3  ;;  %414 = vmatpush3.bf16.msra.mxu0 %v411_v3  ;;  %v27_v13 = vld [vmem:[%s674_s0 + $0x58] sm:$0xff]  ;;  %v28_v15 = vld [vmem:[%s674_s0 + $0x60] sm:$0xff]  ;;  %v21_v16 = vld [vmem:[%s674_s0 + $0x28] sm:$0xff] }
   0x6   :  { %421 = vmatpush3.bf16.msra.mxu1 %v411_v3  ;;  %416 = vmatprep.subr.bf16.mxu0 %v415_v7  ;;  %v29_v17 = vld [vmem:[%s674_s0 + $0x68] sm:$0xff]  ;;  %v22_v18 = vld [vmem:[%s674_s0 + $0x30] sm:$0xff]  ;;  %v23_v20 = vld [vmem:[%s674_s0 + $0x38] sm:$0xff] }
   0x7   :  { %420 = vmatprep.subr.bf16.mxu1 %v415_v7  ;;  %v30_v19 = vld [vmem:[%s674_s0 + $0x70] sm:$0xff]  ;;  %v31_v21 = vld [vmem:[%s674_s0 + $0x78] sm:$0xff]  ;;  %v342_v22 = vld [vmem:[%s675_s2] ss:$0 sm:$0xff] }
   0x9   :  { %418 = vmatpush3.bf16.msra.mxu0 %v415_v7 }
   0xa   :  { %422 = vmatpush3.bf16.msra.mxu1 %v415_v7 }
   0xc   :  { %388 = vmatmul.mubr.msk.f32.vlgmr.msra.gmra.mrb[0].mxu0 %vm43_vm0, %v17_v8 }
   0xd   :  { %400 = vmatmul.mubr.msk.f32.vlgmr.msra.gmra.mrb[0].mxu1 %vm43_vm0, %v25_v9  ;;  %390 = vmatprep.mubr.msk.f32.mxu0 %vm43_vm0, %v18_v10 }
   0xe   :  { %402 = vmatprep.mubr.msk.f32.mxu1 %vm43_vm0, %v26_v11 }
  0x10   :  { %391 = vmatmul.mubr.msk.f32.gmra.mrb[2].mxu0 %vm43_vm0, %v19_v12 }
  0x11   :  { %403 = vmatmul.mubr.msk.f32.gmra.mrb[2].mxu1 %vm43_vm0, %v27_v13  ;;  %393 = vmatprep.mubr.msk.f32.mxu0 %vm43_vm0, %v20_v14 }
  0x12   :  { %405 = vmatprep.mubr.msk.f32.mxu1 %vm43_vm0, %v28_v15 }
  0x14   :  { %394 = vmatmul.mubr.msk.f32.gmra.mrb[4].mxu0 %vm43_vm0, %v21_v16 }
  0x15   :  { %406 = vmatmul.mubr.msk.f32.gmra.mrb[4].mxu1 %vm43_vm0, %v29_v17  ;;  %396 = vmatprep.mubr.msk.f32.mxu0 %vm43_vm0, %v22_v18 }
  0x16   :  { %408 = vmatprep.mubr.msk.f32.mxu1 %vm43_vm0, %v30_v19 }
  0x18   :  { %397 = vmatmul.mubr.msk.f32.gmra.mrb[6].mxu0 %vm43_vm0, %v23_v20 }
  0x19   :  { %409 = vmatmul.mubr.msk.f32.gmra.mrb[6].mxu1 %vm43_vm0, %v31_v21 }
  0xdf   :  { %v389_v23 = vpop.f32.mrb[0].mxu0 }
  0xe0   :  { %v401_v24 = vpop.f32.mrb[0].mxu1  ;;  %v164_v25 = vadd.f32 %v389_v23, %v342_v22  ;;  %v158_v27 = vpop.f32.mrb[1].mxu0 }
  0xe1   :  { %v204_v26 = vadd.f32 %v401_v24, %v342_v22  ;;  %v198_v28 = vpop.f32.mrb[1].mxu1  ;;  %v159_v29 = vadd.f32 %v342_v22, %v158_v27 }
  0xe2   :  { %v199_v30 = vadd.f32 %v342_v22, %v198_v28  ;;  %238 = vst.msk [vmem:[%s676_s3 + $0x8] sm:$0xff] %vm43_vm0, %v164_v25  ;;  %271 = vrot.lane.b32.xlu0 %v164_v25, %s424_s6 }
  0xe3   :  { %246 = vst.msk [vmem:[%s676_s3 + $0x48] sm:$0xff] %vm43_vm0, %v204_v26  ;;  %287 = vrot.lane.b32.xlu1 %v204_v26, %s424_s6  ;;  %237 = vst.msk [vmem:[%s676_s3] sm:$0xff] %vm43_vm0, %v159_v29  ;;  %v392_v31 = vpop.f32.mrb[2].mxu0 }
  0xe4   :  { %245 = vst.msk [vmem:[%s676_s3 + $0x40] sm:$0xff] %vm43_vm0, %v199_v30  ;;  %v404_v32 = vpop.f32.mrb[2].mxu1  ;;  %v174_v33 = vadd.f32 %v392_v31, %v342_v22  ;;  %v168_v34 = vpop.f32.mrb[3].mxu0 }
  0xe5   :  { %v214_v35 = vadd.f32 %v404_v32, %v342_v22  ;;  %v208_v36 = vpop.f32.mrb[3].mxu1  ;;  %v169_v37 = vadd.f32 %v342_v22, %v168_v34 }
  0xe6   :  { %v209_v38 = vadd.f32 %v342_v22, %v208_v36  ;;  %240 = vst.msk [vmem:[%s676_s3 + $0x18] sm:$0xff] %vm43_vm0, %v174_v33  ;;  %269 = vrot.lane.b32.xlu0 %v159_v29, %s424_s6 }
  0xe7   :  { %248 = vst.msk [vmem:[%s676_s3 + $0x58] sm:$0xff] %vm43_vm0, %v214_v35  ;;  %275 = vrot.lane.b32.xlu1 %v174_v33, %s424_s6  ;;  %239 = vst.msk [vmem:[%s676_s3 + $0x10] sm:$0xff] %vm43_vm0, %v169_v37  ;;  %v395_v39 = vpop.f32.mrb[4].mxu0 }
  0xe8   :  { %247 = vst.msk [vmem:[%s676_s3 + $0x50] sm:$0xff] %vm43_vm0, %v209_v38  ;;  %v407_v40 = vpop.f32.mrb[4].mxu1  ;;  %v184_v41 = vadd.f32 %v395_v39, %v342_v22  ;;  %v178_v42 = vpop.f32.mrb[5].mxu0 }
  0xe9   :  { %v224_v43 = vadd.f32 %v407_v40, %v342_v22  ;;  %v218_v44 = vpop.f32.mrb[5].mxu1  ;;  %v179_v45 = vadd.f32 %v342_v22, %v178_v42 }
  0xea   :  { %v219_v46 = vadd.f32 %v342_v22, %v218_v44  ;;  %285 = vrot.lane.b32.xlu0 %v199_v30, %s424_s6  ;;  %242 = vst.msk [vmem:[%s676_s3 + $0x28] sm:$0xff] %vm43_vm0, %v184_v41 }
  0xeb   :  { %291 = vrot.lane.b32.xlu1 %v214_v35, %s424_s6  ;;  %250 = vst.msk [vmem:[%s676_s3 + $0x68] sm:$0xff] %vm43_vm0, %v224_v43  ;;  %241 = vst.msk [vmem:[%s676_s3 + $0x20] sm:$0xff] %vm43_vm0, %v179_v45  ;;  %v398_v47 = vpop.f32.mrb[6].mxu0 }
  0xec   :  { %249 = vst.msk [vmem:[%s676_s3 + $0x60] sm:$0xff] %vm43_vm0, %v219_v46  ;;  %v410_v48 = vpop.f32.mrb[6].mxu1  ;;  %v194_v49 = vadd.f32 %v398_v47, %v342_v22  ;;  %v188_v50 = vpop.f32.mrb[7].mxu0 }
  0xed   :  { %v234_v51 = vadd.f32 %v410_v48, %v342_v22  ;;  %v228_v52 = vpop.f32.mrb[7].mxu1  ;;  %v189_v53 = vadd.f32 %v342_v22, %v188_v50 }
  0xee   :  { %v229_v54 = vadd.f32 %v342_v22, %v228_v52  ;;  %289 = vrot.lane.b32.xlu0 %v209_v38, %s424_s6  ;;  %244 = vst.msk [vmem:[%s676_s3 + $0x38] sm:$0xff] %vm43_vm0, %v194_v49 }
  0xef   :  { %273 = vrot.lane.b32.xlu1 %v169_v37, %s424_s6  ;;  %252 = vst.msk [vmem:[%s676_s3 + $0x78] sm:$0xff] %vm43_vm0, %v234_v51  ;;  %243 = vst.msk [vmem:[%s676_s3 + $0x30] sm:$0xff] %vm43_vm0, %v189_v53 }
  0xf0   :  { %251 = vst.msk [vmem:[%s676_s3 + $0x70] sm:$0xff] %vm43_vm0, %v229_v54 }
  0xf2   :  { %277 = vrot.lane.b32.xlu0 %v179_v45, %s424_s6 }
  0xf3   :  { %279 = vrot.lane.b32.xlu1 %v184_v41, %s424_s6 }
  0xf6   :  { %293 = vrot.lane.b32.xlu0 %v219_v46, %s424_s6 }
  0xf7   :  { %295 = vrot.lane.b32.xlu1 %v224_v43, %s424_s6 }
  0xfa   :  { %281 = vrot.lane.b32.xlu0 %v189_v53, %s424_s6 }
  0xfb   :  { %283 = vrot.lane.b32.xlu1 %v194_v49, %s424_s6 }
  0xfe   :  { %297 = vrot.lane.b32.xlu0 %v229_v54, %s424_s6 }
  0xff   :  { %299 = vrot.lane.b32.xlu1 %v234_v51, %s424_s6 }
 0x154   :  { %v272_v56 = vpop.permute.xlu0 %271 }
 0x155   :  { %v288_v55 = vpop.permute.xlu1 %287  ;;  %319 = vst.msk [vmem:[%s677_s4 + $0x8] sm:$0xff] %vm317_vm1, %v272_v56 }
 0x156   :  { %327 = vst.msk [vmem:[%s677_s4 + $0x48] sm:$0xff] %vm317_vm1, %v288_v55 }
 0x158   :  { %v270_v58 = vpop.permute.xlu0 %269 }
 0x159   :  { %v276_v57 = vpop.permute.xlu1 %275  ;;  %318 = vst.msk [vmem:[%s677_s4] sm:$0xff] %vm317_vm1, %v270_v58 }
 0x15a   :  { %321 = vst.msk [vmem:[%s677_s4 + $0x18] sm:$0xff] %vm317_vm1, %v276_v57 }
 0x15c   :  { %v286_v60 = vpop.permute.xlu0 %285 }
 0x15d   :  { %v292_v59 = vpop.permute.xlu1 %291  ;;  %326 = vst.msk [vmem:[%s677_s4 + $0x40] sm:$0xff] %vm317_vm1, %v286_v60 }
 0x15e   :  { %329 = vst.msk [vmem:[%s677_s4 + $0x58] sm:$0xff] %vm317_vm1, %v292_v59 }
 0x160   :  { %v290_v62 = vpop.permute.xlu0 %289 }
 0x161   :  { %v274_v61 = vpop.permute.xlu1 %273  ;;  %328 = vst.msk [vmem:[%s677_s4 + $0x50] sm:$0xff] %vm317_vm1, %v290_v62 }
 0x162   :  { %320 = vst.msk [vmem:[%s677_s4 + $0x10] sm:$0xff] %vm317_vm1, %v274_v61 }
 0x164   :  { %v278_v0 = vpop.permute.xlu0 %277 }
 0x165   :  { %v280_v63 = vpop.permute.xlu1 %279  ;;  %322 = vst.msk [vmem:[%s677_s4 + $0x20] sm:$0xff] %vm317_vm1, %v278_v0 }
 0x166   :  { %323 = vst.msk [vmem:[%s677_s4 + $0x28] sm:$0xff] %vm317_vm1, %v280_v63 }
 0x168   :  { %v294_v2 = vpop.permute.xlu0 %293 }
 0x169   :  { %v296_v1 = vpop.permute.xlu1 %295  ;;  %330 = vst.msk [vmem:[%s677_s4 + $0x60] sm:$0xff] %vm317_vm1, %v294_v2 }
 0x16a   :  { %331 = vst.msk [vmem:[%s677_s4 + $0x68] sm:$0xff] %vm317_vm1, %v296_v1 }
 0x16c   :  { %v282_v4 = vpop.permute.xlu0 %281 }
 0x16d   :  { %v284_v3 = vpop.permute.xlu1 %283  ;;  %324 = vst.msk [vmem:[%s677_s4 + $0x30] sm:$0xff] %vm317_vm1, %v282_v4 }
 0x16e   :  { %325 = vst.msk [vmem:[%s677_s4 + $0x38] sm:$0xff] %vm317_vm1, %v284_v3 }
 0x170   :  { %v298_v6 = vpop.permute.xlu0 %297 }
 0x171   :  { %v300_v5 = vpop.permute.xlu1 %299  ;;  %332 = vst.msk [vmem:[%s677_s4 + $0x70] sm:$0xff] %vm317_vm1, %v298_v6 }
 0x172   :  { %333 = vst.msk [vmem:[%s677_s4 + $0x78] sm:$0xff] %vm317_vm1, %v300_v5 }

</bundles_post_ra>
